<compile_context>
chip_gen: v7x
topology: tpu7x:2x2x1
jax: 0.10.0
libtpu: 0.0.40
codegen_flags: <defaults>
</compile_context>

<pallas_src>
import math

import jax
import jax.numpy as jnp
from jax.experimental import pallas as pl
from jax.experimental.pallas import tpu as pltpu


def pos_embed_kernel(x_ref, pe_ref, o_ref):
    # x_ref/o_ref: (1, ts, d_model)   pe_ref: (ts, d_model)
    x = x_ref[...]
    pe = pe_ref[...].astype(x.dtype)
    # dropout (inference mode) == identity
    o_ref[...] = (x + pe[None, :, :]).astype(o_ref.dtype)


def make_pe_table(max_len, d_model, dtype=jnp.float32):
    """Sinusoidal positional-encoding table, identical to the PyTorch buffer."""
    position = jnp.arange(max_len, dtype=jnp.float32)[:, None]              # (max_len, 1)
    div_term = jnp.exp(
        jnp.arange(0, d_model, 2, dtype=jnp.float32) * (-(math.log(10000.0) / d_model))
    )                                                                        # (d_model//2,)
    angles = position * div_term                                             # (max_len, d_model//2)
    pe = jnp.zeros((max_len, d_model), jnp.float32)
    pe = pe.at[:, 0::2].set(jnp.sin(angles))
    pe = pe.at[:, 1::2].set(jnp.cos(angles))
    return pe.astype(dtype)


def position_embedding(x, pe, *, ts=256):
    """x: (batch, seq, d_model). pe: (max_len, d_model) precomputed table."""
    batch, seq, d_model = x.shape
    max_len, pe_d = pe.shape
    assert pe_d == d_model, "pe table width must match d_model"
    assert max_len >= seq, "sequence longer than the positional-encoding table"

    # Seq tile: as large as possible (memory-bound op), clamped to seq.
    ts = min(ts, seq)
    assert seq % ts == 0, "seq must be divisible by the seq tile"
    assert ts == seq or ts % 8 == 0, "seq tile must be a multiple of 8 (sublane)"

    elt = jnp.dtype(x.dtype).itemsize
    cost = pl.CostEstimate(
        flops=batch * seq * d_model,                        # one add per element
        transcendentals=0,
        bytes_accessed=2 * x.size * elt + seq * d_model * jnp.dtype(pe.dtype).itemsize,
    )

    # Grid: (seq_tiles, batch). Inner (fastest) axis is batch, so the pe tile's
    # block index is unchanged across the inner loop -> Pallas skips re-DMA.
    return pl.pallas_call(
        pos_embed_kernel,
        out_shape=jax.ShapeDtypeStruct((batch, seq, d_model), x.dtype),
        grid_spec=pltpu.PrefetchScalarGridSpec(
            num_scalar_prefetch=0,
            grid=(seq // ts, batch),
            in_specs=[
                pl.BlockSpec((1, ts, d_model), lambda j, b: (b, j, 0)),   # x tile
                pl.BlockSpec((ts, d_model), lambda j, b: (j, 0)),         # pe tile (seq-only)
            ],
            out_specs=pl.BlockSpec((1, ts, d_model), lambda j, b: (b, j, 0)),
        ),
        compiler_params=pltpu.CompilerParams(
            dimension_semantics=("parallel", "parallel"),
        ),
        cost_estimate=cost,
    )(x, pe)


def pure_jax_ref(x, pe):
    seq = x.shape[1]
    return x + pe[None, :seq, :].astype(x.dtype)


if __name__ == "__main__":
    # Small but lane-dense shapes: d_model=512 (module default, multiple of 128).
    batch, seq, d_model, max_len = 2, 8, 512, 64

    key = jax.random.PRNGKey(0)
    x = jax.random.normal(key, (batch, seq, d_model), dtype=jnp.float32)

    pe = make_pe_table(max_len, d_model, dtype=jnp.float32)

    out = position_embedding(x, pe)
    out = jax.block_until_ready(out)

    ref = pure_jax_ref(x, pe)
    assert out.shape == (batch, seq, d_model)
    assert jnp.allclose(out, ref, atol=1e-6, rtol=1e-6), "mismatch vs pure-JAX reference"

    print("KERNEL_OK")
</pallas_src>

<mosaic_0001>
module attributes {stable_mosaic.version = 11 : i64} {
  func.func @pos_embed_kernel(%arg0: i32, %arg1: i32, %arg2: memref<1x8x512xf32, #tpu.memory_space<vmem>>, %arg3: memref<8x512xf32, #tpu.memory_space<vmem>>, %arg4: memref<1x8x512xf32, #tpu.memory_space<vmem>>) attributes {dimension_semantics = [#tpu.dimension_semantics<parallel>, #tpu.dimension_semantics<parallel>], iteration_bounds = array<i64: 1, 2>, scalar_prefetch = 0 : i64, scratch_operands = 0 : i64, tpu.core_type = #tpu.core_type<tc>, window_params = [{transform_indices = @transform_0, window_bounds = array<i64: 1, 8, 512>}, {transform_indices = @transform_1, window_bounds = array<i64: 8, 512>}, {transform_indices = @transform_2, window_bounds = array<i64: 1, 8, 512>}]} {
    %c0 = arith.constant 0 : index
    %c0_0 = arith.constant 0 : index
    %c0_1 = arith.constant 0 : index
    %0 = vector.load %arg2[%c0, %c0_0, %c0_1] : memref<1x8x512xf32, #tpu.memory_space<vmem>>, vector<1x8x512xf32>
    %c0_2 = arith.constant 0 : index
    %c0_3 = arith.constant 0 : index
    %1 = vector.load %arg3[%c0_2, %c0_3] : memref<8x512xf32, #tpu.memory_space<vmem>>, vector<8x512xf32>
    %2 = vector.shape_cast %1 : vector<8x512xf32> to vector<1x8x512xf32>
    %3 = arith.addf %0, %2 : vector<1x8x512xf32>
    %c0_4 = arith.constant 0 : index
    %c0_5 = arith.constant 0 : index
    %c0_6 = arith.constant 0 : index
    %4 = vector.load %arg4[%c0_4, %c0_5, %c0_6] : memref<1x8x512xf32, #tpu.memory_space<vmem>>, vector<1x8x512xf32>
    tpu.vector_store %arg4[%c0_4, %c0_5, %c0_6], %3 {strides = array<i32>} : memref<1x8x512xf32, #tpu.memory_space<vmem>>, vector<1x8x512xf32>,
    return
  }
  func.func @transform_0(%arg0: i32, %arg1: i32) -> (i32, i32, i32) {
    %c0_i32 = arith.constant 0 : i32
    %c0_i32_0 = arith.constant 0 : i32
    return %arg1, %arg0, %c0_i32 : i32, i32, i32
  }
  func.func @transform_1(%arg0: i32, %arg1: i32) -> (i32, i32) {
    %c0_i32 = arith.constant 0 : i32
    %c0_i32_0 = arith.constant 0 : i32
    return %arg0, %c0_i32 : i32, i32
  }
  func.func @transform_2(%arg0: i32, %arg1: i32) -> (i32, i32, i32) {
    %c0_i32 = arith.constant 0 : i32
    %c0_i32_0 = arith.constant 0 : i32
    return %arg1, %arg0, %c0_i32 : i32, i32, i32
  }
}

</mosaic_0001>

<bundles_post_ra>
// kernel: tpu_custom_call.1
= control target key start
LH: loop header
LB: loop body
LE: loop exit
PB: predicated region body
PF: predicated region fallthrough
CT: control target
= control target key end

     0   :  { %7 = vsyncpa [#allocation3], 0  ;;  %s803_s0 = inlined_call_operand.hbm [shape: f32[2,8,512], index: 0, kind: input, shape index: {}]   ;;  %s804_s1 = inlined_call_operand.hbm [shape: f32[64,512], index: 1, kind: input, shape index: {}]   ;;  %s805_s2 = inlined_call_operand.hbm [shape: f32[2,8,512], index: 2, kind: output, shape index: {}]  }
   0x1   :  { %9 = vsyncpa [#allocation3 + $0x1], 0 }
   0x2   :  { %10 = vsyncpa [#allocation6], 0 }
   0x3   :  { %11 = vsyncpa [#allocation4], 0 }
   0x4   :  { %13 = vsyncpa [#allocation4 + $0x1], 0  ;;  %s584_s9 = smov 0   ;;  %s586_s10 = smov 0  }
   0x5   :  { %s588_s11 = smov 0   ;;  %s590_s12 = smov 0  }
   0x6   :  { %s592_s13 = smov 0   ;;  %s594_s14 = smov 0  }
   0x7 LB: > { %s328_s15 = sadd.s32 4294967295, %s564_s14   ;;  %s329_s16 = sadd.s32 4294967294, %s564_s14   ;;  %s564_s14 = sphi %s594_s14, %s19_s14   ;;  %s560_s13 = sphi %s592_s13, %s830_s13   ;;  %s556_s12 = sphi %s590_s12, %s829_s12   ;;  %s552_s11 = sphi %s588_s11, %s828_s11   ;;  %s548_s10 = sphi %s586_s10, %s827_s10   ;;  %s544_s9 = sphi %s584_s9, %s826_s9  }
   0x8   : > { %p53_p0 = scmp.ne.s32.totalorder %s548_s10, %s544_s9  ;;  %p618_p1 = scmp.eq.s32.totalorder %s328_s15, 0 }
   0x9   : > { %p622_p2 = scmp.eq.s32.totalorder %s328_s15, 1  ;;  %p111_p3 = scmp.eq.s32.totalorder %s329_s16, 1 }
   0xa   : > { %s810_s17 = scalar_select %p618_p1, 1, 0 }
   0xb   : > { %s811_s18 = scalar_select %p622_p2, 1, 0 }
   0xc   : > { %p628_p4 = por %p618_p1, %p53_p0  ;;  %p330_p5 = scmp.ge.s32.totalorder %s564_s14, 1 }
   0xd   : > { %p633_p6 = por %p111_p3, %p53_p0  ;;  %p118_p7 = scmp.lt.s32.totalorder %s564_s14, 3 }
   0xe   : > { %s812_s19 = scalar_select %p628_p4, 1, 0 }
   0xf   : > { %s813_s20 = scalar_select %p633_p6, 1, 0 }
  0x10   : > { %p638_p8 = pnand %p330_p5, %p118_p7  ;;  %s566_s22 = smov [#allocation5]  }
  0x11   : > { %s134_s23 = sshll.u32 %s566_s22, 4  ;;  %s28_s25 = sadd.s32 1, %s560_s13  ;;  %s135_s23 = int_to_ptr.vmem [resolvable:$true] %s134_s23 }
  0x12   : > { %s814_s21 = scalar_select %p638_p8, 1, 0 }
  0x13   : > { %p355_p10 = pneg %p638_p8  ;;  %s40_s26 = sadd.s32 1, %s552_s11 }
  0x14   : > { %p653_p12 = scmp.ge.s32.totalorder %s28_s25, 2  ;;  %s420_s30 = scalar_lea.hbm %s804_s1, 512 }
  0x15   : > { %p647_p11 = pnand %p355_p10, %p618_p1  ;;  %p421_p13 = scmp.ne.s32.totalorder %s804_s1, %s420_s30 }
  0x16   : > { %s816_s27 = scalar_select %p653_p12, 1, 0 }
  0x17   : > { %p422_p0 = pneg %p647_p11  ;;  %s425_s7 = scalar_lea.hbm %s804_s1, 4096 }
  0x18   : > { %p426_p7 = scmp.lt.u32.totalorder %s425_s7, %s420_s30  ;;  %p427_p10 = scmp.lt.u32.totalorder %s420_s30, %s804_s1 }
  0x19   : > { %p423_p3 = pnand %p422_p0, %p421_p13 }
  0x1a   : > { %p428_p9 = por %p427_p10, %p426_p7 }
  0x1b   : > { %p424_p5 = pneg %p423_p3 }
  0x1d   : > { %p429_p6 = pnand %p428_p9, %p424_p5 }
  0x1f   : > { %432 = shalt.err (!%p429_p6)
}
  0x20   : > { %s433_s16 = scalar_lea.vmem %s135_s23, 512  ;;  %p441_p2 = scmp.lt.s32.totalorder %s135_s23, %s135_s23 }
  0x21   : > { %p434_p1 = scmp.ne.s32.totalorder %s135_s23, %s433_s16  ;;  %p442_p12 = scmp.lt.s32.totalorder %s433_s16, %s433_s16 }
  0x23   : > { %p436_p4 = pnand %p434_p1, %p422_p0  ;;  %p443_p13 = por %p442_p12, %p441_p2 }
  0x25   : > { %p437_p8 = pneg %p436_p4 }
  0x27   : > { %p444_p3 = pnand %p443_p13, %p437_p8 }
  0x29   : > { %447 = shalt.err (!%p444_p3)
}
  0x2a   : > { %358 = dma.hbm_to_vmem [thread:$0]  (!%p647_p11), %s804_s1, 512, %s135_s23, [#allocation6]  }
  0x2b   : > { %p817_p1 = scmp.ne.s32.totalorder %s816_s27, 0  ;;  %p47_p2 = scmp.ne.s32.totalorder %s552_s11, %s548_s10 }
  0x2c   : > { %p48_p4 = scmp.eq.s32.totalorder %s564_s14, 0  ;;  %p368_p6 = scmp.lt.s32.totalorder %s564_s14, 2 }
  0x2d   : > { %s832_s25 = smov (%p817_p1, %s28_s25), 0  ;;  %p818_p12 = scmp.ne.s32.totalorder %s811_s18, 0 }
  0x2e   : > { %s35_s24 = ssub.s32 %s560_s13, %s832_s25  ;;  %p49_p9 = por %p48_p4, %p47_p2 }
  0x2f   : > { %p38_p8 = scmp.eq.s32.totalorder %s35_s24, 0  ;;  %p688_p0 = por %p818_p12, %p47_p2 }
  0x30   : > { %s145_s30 = sand.u32 1, %s552_s11   ;;  %s345_s27 = sshll.u32 %s560_s13, 9 }
  0x31   : > { %s696_s3 = scalar_select %p38_p8, %s552_s11, %s40_s26  }
  0x32   : > { %s333_s23 = sshll.u32 %s145_s30, 5  ;;  %s702_s6 = scalar_lea.hbm %s803_s0, %s345_s27 }
  0x33   : > { %s149_s18 = scalar_lea.vmem [#allocation2], %s333_s23  ;;  %p706_p11 = pnand %p368_p6, %p49_p9 }
  0x34   : > { %s159_s7 = sshll.u32 %s149_s18, 4  ;;  %s146_s26 = scalar_lea.sflag [#allocation3], %s145_s30  ;;  %s704_s7 = int_to_ptr.vmem [resolvable:$true] %s159_s7 }
  0x35   : > { %s448_s15 = scalar_lea.hbm %s702_s6, 512  ;;  %p450_p7 = pneg %p706_p11 }
  0x36   : > { %p449_p5 = scmp.ne.s32.totalorder %s702_s6, %s448_s15  ;;  %s453_s28 = scalar_lea.hbm %s803_s0, 1024 }
  0x37   : > { %p454_p3 = scmp.lt.u32.totalorder %s702_s6, %s803_s0  ;;  %p455_p1 = scmp.lt.u32.totalorder %s453_s28, %s448_s15 }
  0x38   : > { %p451_p10 = pnand %p450_p7, %p449_p5  ;;  %p457_p4 = scmp.lt.u32.totalorder %s448_s15, %s702_s6 }
  0x39   : > { %p456_p2 = por %p455_p1, %p454_p3 }
  0x3a   : > { %p452_p13 = pneg %p451_p10 }
  0x3b   : > { %p458_p6 = por %p457_p4, %p456_p2 }
  0x3d   : > { %p459_p8 = pnand %p458_p6, %p452_p13 }
  0x3f   : > { %462 = shalt.err (!%p459_p8)
}
  0x40   : > { %s463_s30 = scalar_lea.vmem %s704_s7, 512  ;;  %s567_s27 = smov [#allocation2]  }
  0x41   : > { %p464_p9 = scmp.ne.s32.totalorder %s704_s7, %s463_s30  ;;  %s468_s4 = sshll.u32 %s567_s27, 4  ;;  %s469_s4 = int_to_ptr.vmem [resolvable:$false] %s468_s4 }
  0x42   : > { %s470_s5 = scalar_lea.vmem %s469_s4, 1024  ;;  %p471_p10 = scmp.lt.s32.totalorder %s704_s7, %s469_s4 }
  0x43   : > { %p466_p12 = pnand %p464_p9, %p450_p7  ;;  %p472_p3 = scmp.lt.s32.totalorder %s470_s5, %s463_s30 }
  0x45   : > { %p467_p5 = pneg %p466_p12  ;;  %p473_p1 = por %p472_p3, %p471_p10 }
  0x47   : > { %p474_p2 = pnand %p473_p1, %p467_p5 }
  0x49   : > { %477 = shalt.err (!%p474_p2)
}
  0x4a   : > { %362 = dma.hbm_to_vmem [thread:$0]  (!%p706_p11), %s702_s6, 512, %s704_s7, %s146_s26  }
  0x4b   : > { %p821_p13 = scmp.ne.s32.totalorder %s814_s21, 0 }
  0x4c   : > { %s738_s18 = sand.u32 (!%p821_p13), 1, %s548_s10   ;;  %p822_p7 = scmp.ne.s32.totalorder (!%p821_p13), %s812_s19, 0 }
  0x4d   : > { %168 = sbr.rel (%p821_p13) target bundleno = 113 (0x71), region = 28  ;;  %s337_s15 = sshll.u32 (!%p821_p13), %s738_s18, 5 }
  0x4e   : > { %s171_s16 = scalar_lea.sflag (!%p821_p13), [#allocation3], %s738_s18  ;;  %s174_s22 = scalar_lea.vmem (!%p821_p13), [#allocation2], %s337_s15 }
  0x54   : > { %531 = dma.done.wait (%p822_p7), %s171_s16, 512  }
  0x55   : > { %533 = vsyncadd (%p822_p7), %s171_s16, 4294966784  ;;  %p823_p4 = scmp.ne.s32.totalorder %s810_s17, 0 }
  0x57   : > { %535 = dma.done.wait (%p823_p4), [#allocation6], 512  }
  0x58   : > { %537 = vsyncadd (%p823_p4), [#allocation6], 4294966784  ;;  %v199_v0 = vld [vmem:[%s174_s22] sm:$0xff]  ;;  %s198_s21 = scalar_lea.vmem [#allocation7], %s337_s15  ;;  %v200_v2 = vld [vmem:[%s174_s22 + $0x8] sm:$0xff]  ;;  %s346_s7 = sshll.u32 %s556_s12, 9 }
  0x59   : > { %v203_v1 = vld [vmem:[#allocation5] sm:$0xff]  ;;  %s232_s6 = sshll.u32 %s198_s21, 4  ;;  %v204_v4 = vld [vmem:[#allocation5 + $0x8] sm:$0xff]  ;;  %v201_v5 = vld [vmem:[%s174_s22 + $0x10] sm:$0xff]  ;;  %s756_s12 = scalar_lea.hbm %s805_s2, %s346_s7  ;;  %s751_s6 = int_to_ptr.vmem [resolvable:$true] %s232_s6 }
  0x5a   : > { %v207_v3 = vadd.f32 %v203_v1, %v199_v0  ;;  %v205_v6 = vld [vmem:[#allocation5 + $0x10] sm:$0xff]  ;;  %v208_v7 = vadd.f32 %v204_v4, %v200_v2  ;;  %v202_v9 = vld [vmem:[%s174_s22 + $0x18] sm:$0xff]  ;;  %s216_s8 = scalar_lea.sflag [#allocation4], %s738_s18  ;;  %s478_s26 = scalar_lea.vmem %s751_s6, 512 }
  0x5b   : > { %v209_v8 = vadd.f32 %v205_v6, %v201_v5  ;;  %v206_v10 = vld [vmem:[#allocation5 + $0x18] sm:$0xff]  ;;  %p479_p11 = scmp.ne.s32.totalorder %s751_s6, %s478_s26  ;;  %s568_s28 = smov [#allocation7]  }
  0x5c   : > { %211 = vst [vmem:[%s198_s21] sm:$0xff] %v207_v3  ;;  %v210_v11 = vadd.f32 %v206_v10, %v202_v9  ;;  %212 = vst [vmem:[%s198_s21 + $0x8] sm:$0xff] %v208_v7  ;;  %s482_s24 = sshll.u32 %s568_s28, 4  ;;  %s483_s24 = int_to_ptr.vmem [resolvable:$false] %s482_s24 }
  0x5d   : > { %213 = vst [vmem:[%s198_s21 + $0x10] sm:$0xff] %v209_v8  ;;  %p480_p6 = pnand %p479_p11, %p688_p0  ;;  %s484_s23 = scalar_lea.vmem %s483_s24, 1024 }
  0x5e   : > { %214 = vst [vmem:[%s198_s21 + $0x18] sm:$0xff] %v210_v11  ;;  %p485_p9 = scmp.lt.s32.totalorder %s751_s6, %s483_s24  ;;  %p486_p12 = scmp.lt.s32.totalorder %s484_s23, %s478_s26 }
  0x5f   : > { %p481_p8 = pneg %p480_p6 }
  0x60   : > { %p487_p5 = por %p486_p12, %p485_p9 }
  0x62   : > { %p488_p10 = pnand %p487_p5, %p481_p8 }
  0x64   : > { %491 = shalt.err (!%p488_p10)
}
  0x65   : > { %s492_s30 = scalar_lea.hbm %s756_s12, 512  ;;  %s496_s5 = scalar_lea.hbm %s805_s2, 1024 }
  0x66   : > { %p493_p3 = scmp.ne.s32.totalorder %s756_s12, %s492_s30  ;;  %p497_p13 = scmp.lt.u32.totalorder %s756_s12, %s805_s2 }
  0x67   : > { %p498_p7 = scmp.lt.u32.totalorder %s496_s5, %s492_s30  ;;  %p500_p11 = scmp.lt.u32.totalorder %s492_s30, %s756_s12 }
  0x68   : > { %p494_p1 = pnand %p493_p3, %p688_p0 }
  0x69   : > { %p499_p4 = por %p498_p7, %p497_p13 }
  0x6a   : > { %p495_p2 = pneg %p494_p1 }
  0x6b   : > { %p501_p6 = por %p500_p11, %p499_p4 }
  0x6d   : > { %p502_p8 = pnand %p501_p6, %p495_p2 }
  0x6f   : > { %505 = shalt.err (!%p502_p8)
}
  0x70   : > { %353 = dma.vmem_to_hbm [thread:$0]  (%p688_p0), %s751_s6, 512, %s756_s12, %s216_s8  }
  0x71 PF: > { %s244_s16 = sand.u32 1, %s544_s9   ;;  %p824_p9 = scmp.ne.s32.totalorder %s813_s20, 0 }
  0x72   : > { %p825_p12 = scmp.ge.s32.totalorder %s564_s14, 2  ;;  %s245_s22 = scalar_lea.sflag [#allocation4], %s244_s16 }
  0x74   : > { %p364_p5 = pnand %p825_p12, %p824_p9 }
  0x76   : > { %539 = dma.done.wait (!%p364_p5), %s245_s22, 512  }
  0x77   : > { %541 = vsyncadd (!%p364_p5), %s245_s22, 4294966784  ;;  %s19_s14 = sadd.s32 1, %s564_s14   ;;  %s826_s9 = smov %s548_s10 }
  0x78   : > { %p16_p10 = scmp.ge.s32.totalorder %s19_s14, 4   ;;  %s827_s10 = smov %s552_s11 }
  0x79   : > { %s828_s11 = smov %s696_s3  ;;  %s829_s12 = smov %s560_s13 }
  0x7a   : > { %s830_s13 = smov %s832_s25  ;;  %18 = sbr.rel (!%p16_p10) target bundleno = 7 (0x7), region = 78 }
  0x81   :  { %250 = vsyncpa [#allocation3], 1 }
  0x82   :  { %252 = vsyncpa [#allocation3 + $0x1], 1 }
  0x83   :  { %253 = vsyncpa [#allocation6], 1 }
  0x84   :  { %254 = vsyncpa [#allocation4], 1 }
  0x85   :  { %256 = vsyncpa [#allocation4 + $0x1], 1 }

</bundles_post_ra>
